<compile_context>
chip_gen: v7x
topology: tpu7x:2x2x1
jax: 0.10.0
libtpu: 0.0.40
codegen_flags: <defaults>
</compile_context>

<pallas_src>
import jax
import jax.numpy as jnp
from jax.experimental import pallas as pl
from jax.experimental.pallas import tpu as pltpu


# ------------------------------ fused kernel --------------------------------
def _linear_probe_kernel(x_ref, wbd_ref, wt_ref, sel_ref, b_ref, o_ref):
    # x_ref:   [B*C_in,  2*H*W]    channel-major stacked inputs (x1 | x2 along lanes)
    # wbd_ref: [B*C_out, B*C_in]   block-diagonal frozen 1x1-conv weight (transposed)
    # wt_ref:  [2, B*C_out, 2*H*W] frozen fc weight, permuted to feature layout, tiled over B
    # sel_ref: [B, B*C_out]        0/1 per-batch segment-sum selector
    # b_ref:   [1, 2]              fc bias
    # o_ref:   [B, 2]              output logits
    #
    # Feature stage: one MXU matmul for both inputs and the whole batch; features
    # stay resident in VMEM/vregs (never written to HBM).
    feat = jnp.maximum(
        jnp.dot(wbd_ref[...], x_ref[...], preferred_element_type=jnp.float32),
        0.0,
    )  # [B*C_out, 2*H*W]

    # Probe head: elementwise multiply (VPU) + lane-dense segment-sum matmul +
    # lane reduction, per output logit (2 static iterations).
    for o in range(2):
        prod = feat * wt_ref[o]                                    # [B*C_out, 2*H*W]
        seg = jnp.dot(sel_ref[...], prod,
                      preferred_element_type=jnp.float32)          # [B, 2*H*W]
        col = jnp.sum(seg, axis=1, keepdims=True)                  # [B, 1]
        o_ref[:, o:o + 1] = col + b_ref[:, o:o + 1]


# --------------------------- one-time weight prep ----------------------------
def prepare_params(w_conv, w_fc, b_fc, B, H, W):
    """One-time permutes/tiles of the FROZEN weights (no per-forward cost).

    w_conv: [C_in, C_out]  frozen 1x1-conv weight (stand-in feature extractor)
    w_fc:   [2, 2*C_out*H*W]  torch.nn.Linear weight (columns ordered half, c, h, w)
    b_fc:   [2]
    """
    C_in, C_out = w_conv.shape
    HW, S2 = H * W, 2 * H * W

    # Block-diagonal conv weight: FeatAll[b*C_out + c, s] = sum_k wcT[c,k] * XAll[b*C_in + k, s]
    wbd = jnp.kron(jnp.eye(B, dtype=jnp.float32), w_conv.T)       # [B*C_out, B*C_in]

    # fc columns are (half, c, h, w) per torch.flatten + concat; permute once to the
    # kernel's (c, half, h, w) layout, then tile over the batch rows.
    wt = (w_fc.reshape(2, 2, C_out, HW)    # [o, half, c, hw]
              .transpose(0, 2, 1, 3)        # [o, c, half, hw]
              .reshape(2, C_out, S2))       # [o, c, s]
    wt = jnp.tile(wt, (1, B, 1))            # [o, B*C_out, s]

    # Segment-sum selector: sel[b, r] = 1 iff r // C_out == b
    sel = jnp.repeat(jnp.eye(B, dtype=jnp.float32), C_out, axis=1)  # [B, B*C_out]

    return wbd, wt, sel, b_fc.reshape(1, 2)


# -------------------------------- forward -----------------------------------
def linear_probe_forward(x1, x2, wbd, wt, sel, b2d):
    """Fused LinearProbe.forward(x1, x2). x1/x2 are NCHW."""
    B, C_in, H, W = x1.shape
    S2 = 2 * H * W
    BCout = wt.shape[1]

    # Channel-major stacking of the raw inputs: pure reshape + one concat
    # (no transposes, no feature-tensor layout ops).
    xall = jnp.concatenate(
        [x1.reshape(B, C_in, H * W), x2.reshape(B, C_in, H * W)], axis=2
    ).reshape(B * C_in, S2)

    return pl.pallas_call(
        _linear_probe_kernel,
        out_shape=jax.ShapeDtypeStruct((B, 2), jnp.float32),
        grid=(1,),
        in_specs=[
            pl.BlockSpec((B * C_in, S2), lambda i: (0, 0)),
            pl.BlockSpec((BCout, B * C_in), lambda i: (0, 0)),
            pl.BlockSpec((2, BCout, S2), lambda i: (0, 0, 0)),
            pl.BlockSpec((B, BCout), lambda i: (0, 0)),
            pl.BlockSpec((1, 2), lambda i: (0, 0)),
        ],
        out_specs=pl.BlockSpec((B, 2), lambda i: (0, 0)),
        compiler_params=pltpu.CompilerParams(
            dimension_semantics=("arbitrary",)),
    )(xall, wbd, wt, sel, b2d)


# --------------------------------- main --------------------------------------
if __name__ == "__main__":
    key = jax.random.PRNGKey(0)
    k1, k2, k3, k4, k5 = jax.random.split(key, 5)

    B, C, H, W = 2, 4, 16, 16
    C_OUT = 8
    feature_size = C_OUT * H * W                   # 2048 per input

    x1 = jax.random.normal(k1, (B, C, H, W), jnp.float32)
    x2 = jax.random.normal(k2, (B, C, H, W), jnp.float32)

    # deterministic frozen feature-extractor weights (1x1 conv stand-in)
    w_conv = jax.random.normal(k3, (C, C_OUT), jnp.float32) * 0.1

    # fc = torch.nn.Linear(2*feature_size, 2): U(-1/sqrt(in), 1/sqrt(in))
    bound = 1.0 / float(jnp.sqrt(2.0 * feature_size))
    w_fc = jax.random.uniform(k4, (2, 2 * feature_size), jnp.float32, -bound, bound)
    b_fc = jax.random.uniform(k5, (2,), jnp.float32, -bound, bound)

    # one-time frozen-weight preparation (block-diag conv, permuted + tiled fc)
    wbd, wt, sel, b2d = prepare_params(w_conv, w_fc, b_fc, B, H, W)

    fwd = jax.jit(linear_probe_forward)
    out = jax.block_until_ready(fwd(x1, x2, wbd, wt, sel, b2d))

    # plain-JAX reference for correctness (true-f32 precision)
    def _ref_feat(x):
        y = jnp.maximum(
            jnp.einsum("bchw,cf->bfhw", x, w_conv, precision="highest"), 0.0)
        return y.reshape(B, -1)

    xcat = jnp.concatenate([_ref_feat(x1), _ref_feat(x2)], axis=1)
    ref = jnp.einsum("bf,of->bo", xcat, w_fc, precision="highest") + b_fc

    assert out.shape == (B, 2)
    assert jnp.allclose(out, ref, atol=1e-4, rtol=1e-4), (out, ref)

    print("KERNEL_OK")
</pallas_src>

<mosaic_0001>
module attributes {stable_mosaic.version = 11 : i64} {
  func.func @_linear_probe_kernel(%arg0: i32, %arg1: memref<8x512xf32, #tpu.memory_space<vmem>>, %arg2: memref<16x8xf32, #tpu.memory_space<vmem>>, %arg3: memref<2x16x512xf32, #tpu.memory_space<vmem>>, %arg4: memref<2x16xf32, #tpu.memory_space<vmem>>, %arg5: memref<1x2xf32, #tpu.memory_space<vmem>>, %arg6: memref<2x2xf32, #tpu.memory_space<vmem>>) attributes {dimension_semantics = [#tpu.dimension_semantics<arbitrary>], iteration_bounds = array<i64: 1>, scalar_prefetch = 0 : i64, scratch_operands = 0 : i64, tpu.core_type = #tpu.core_type<tc>, window_params = [{pipeline_mode = #tpu.pipeline_mode<synchronous>, transform_indices = @transform_0, window_bounds = array<i64: 8, 512>}, {pipeline_mode = #tpu.pipeline_mode<synchronous>, transform_indices = @transform_1, window_bounds = array<i64: 16, 8>}, {pipeline_mode = #tpu.pipeline_mode<synchronous>, transform_indices = @transform_2, window_bounds = array<i64: 2, 16, 512>}, {pipeline_mode = #tpu.pipeline_mode<synchronous>, transform_indices = @transform_3, window_bounds = array<i64: 2, 16>}, {pipeline_mode = #tpu.pipeline_mode<synchronous>, transform_indices = @transform_4, window_bounds = array<i64: 1, 2>}, {pipeline_mode = #tpu.pipeline_mode<synchronous>, transform_indices = @transform_5, window_bounds = array<i64: 2, 2>}]} {
    %c0 = arith.constant 0 : index
    %c0_0 = arith.constant 0 : index
    %0 = vector.load %arg2[%c0, %c0_0] : memref<16x8xf32, #tpu.memory_space<vmem>>, vector<16x8xf32>
    %c0_1 = arith.constant 0 : index
    %c0_2 = arith.constant 0 : index
    %1 = vector.load %arg1[%c0_1, %c0_2] : memref<8x512xf32, #tpu.memory_space<vmem>>, vector<8x512xf32>
    %cst = arith.constant dense<0.000000e+00> : vector<16x512xf32>
    %2 = tpu.matmul %0, %1, %cst {dimension_numbers = #tpu.dot_dimension_numbers<[1], [0], [0], [1], [0, 0, 1, 1], [], []>} : vector<16x8xf32>, vector<8x512xf32>, vector<16x512xf32> -> vector<16x512xf32>
    %cst_3 = arith.constant 0.000000e+00 : f32
    %3 = vector.broadcast %cst_3 : f32 to vector<16x512xf32>
    %4 = arith.maximumf %2, %3 : vector<16x512xf32>
    %c0_4 = arith.constant 0 : index
    %c0_5 = arith.constant 0 : index
    %c0_6 = arith.constant 0 : index
    %5 = vector.load %arg3[%c0_4, %c0_5, %c0_6] : memref<2x16x512xf32, #tpu.memory_space<vmem>>, vector<1x16x512xf32>
    %6 = vector.shape_cast %5 : vector<1x16x512xf32> to vector<16x512xf32>
    %7 = arith.mulf %4, %6 : vector<16x512xf32>
    %c0_7 = arith.constant 0 : index
    %c0_8 = arith.constant 0 : index
    %8 = vector.load %arg4[%c0_7, %c0_8] : memref<2x16xf32, #tpu.memory_space<vmem>>, vector<2x16xf32>
    %cst_9 = arith.constant dense<0.000000e+00> : vector<2x512xf32>
    %9 = tpu.matmul %8, %7, %cst_9 {dimension_numbers = #tpu.dot_dimension_numbers<[1], [0], [0], [1], [0, 0, 1, 1], [], []>} : vector<2x16xf32>, vector<16x512xf32>, vector<2x512xf32> -> vector<2x512xf32>
    %cst_10 = arith.constant dense<0.000000e+00> : vector<2xf32>
    %10 = vector.multi_reduction <add>, %9, %cst_10 [1] : vector<2x512xf32> to vector<2xf32>
    %11 = vector.shape_cast %10 : vector<2xf32> to vector<2x1xf32>
    %c0_11 = arith.constant 0 : index
    %c0_12 = arith.constant 0 : index
    %12 = vector.load %arg5[%c0_11, %c0_12] : memref<1x2xf32, #tpu.memory_space<vmem>>, vector<1x1xf32>
    %13 = vector.broadcast %12 : vector<1x1xf32> to vector<2x1xf32>
    %14 = arith.addf %11, %13 : vector<2x1xf32>
    %c0_13 = arith.constant 0 : index
    %c0_14 = arith.constant 0 : index
    %15 = vector.load %arg6[%c0_13, %c0_14] : memref<2x2xf32, #tpu.memory_space<vmem>>, vector<2x1xf32>
    tpu.vector_store %arg6[%c0_13, %c0_14], %14 {strides = array<i32>} : memref<2x2xf32, #tpu.memory_space<vmem>>, vector<2x1xf32>,
    %c1 = arith.constant 1 : index
    %c0_15 = arith.constant 0 : index
    %c0_16 = arith.constant 0 : index
    %16 = vector.load %arg3[%c1, %c0_15, %c0_16] : memref<2x16x512xf32, #tpu.memory_space<vmem>>, vector<1x16x512xf32>
    %17 = vector.shape_cast %16 : vector<1x16x512xf32> to vector<16x512xf32>
    %18 = arith.mulf %4, %17 : vector<16x512xf32>
    %c0_17 = arith.constant 0 : index
    %c0_18 = arith.constant 0 : index
    %19 = vector.load %arg4[%c0_17, %c0_18] : memref<2x16xf32, #tpu.memory_space<vmem>>, vector<2x16xf32>
    %cst_19 = arith.constant dense<0.000000e+00> : vector<2x512xf32>
    %20 = tpu.matmul %19, %18, %cst_19 {dimension_numbers = #tpu.dot_dimension_numbers<[1], [0], [0], [1], [0, 0, 1, 1], [], []>} : vector<2x16xf32>, vector<16x512xf32>, vector<2x512xf32> -> vector<2x512xf32>
    %cst_20 = arith.constant dense<0.000000e+00> : vector<2xf32>
    %21 = vector.multi_reduction <add>, %20, %cst_20 [1] : vector<2x512xf32> to vector<2xf32>
    %22 = vector.shape_cast %21 : vector<2xf32> to vector<2x1xf32>
    %c0_21 = arith.constant 0 : index
    %c1_22 = arith.constant 1 : index
    %23 = vector.load %arg5[%c0_21, %c1_22] : memref<1x2xf32, #tpu.memory_space<vmem>>, vector<1x1xf32>
    %24 = vector.broadcast %23 : vector<1x1xf32> to vector<2x1xf32>
    %25 = arith.addf %22, %24 : vector<2x1xf32>
    %c0_23 = arith.constant 0 : index
    %c1_24 = arith.constant 1 : index
    %26 = vector.load %arg6[%c0_23, %c1_24] : memref<2x2xf32, #tpu.memory_space<vmem>>, vector<2x1xf32>
    tpu.vector_store %arg6[%c0_23, %c1_24], %25 {strides = array<i32>} : memref<2x2xf32, #tpu.memory_space<vmem>>, vector<2x1xf32>,
    return
  }
  func.func @transform_0(%arg0: i32) -> (i32, i32) {
    %c0_i32 = arith.constant 0 : i32
    %c0_i32_0 = arith.constant 0 : i32
    %c0_i32_1 = arith.constant 0 : i32
    return %c0_i32, %c0_i32_0 : i32, i32
  }
  func.func @transform_1(%arg0: i32) -> (i32, i32) {
    %c0_i32 = arith.constant 0 : i32
    %c0_i32_0 = arith.constant 0 : i32
    %c0_i32_1 = arith.constant 0 : i32
    return %c0_i32, %c0_i32_0 : i32, i32
  }
  func.func @transform_2(%arg0: i32) -> (i32, i32, i32) {
    %c0_i32 = arith.constant 0 : i32
    %c0_i32_0 = arith.constant 0 : i32
    %c0_i32_1 = arith.constant 0 : i32
    %c0_i32_2 = arith.constant 0 : i32
    return %c0_i32, %c0_i32_0, %c0_i32_1 : i32, i32, i32
  }
  func.func @transform_3(%arg0: i32) -> (i32, i32) {
    %c0_i32 = arith.constant 0 : i32
    %c0_i32_0 = arith.constant 0 : i32
    %c0_i32_1 = arith.constant 0 : i32
    return %c0_i32, %c0_i32_0 : i32, i32
  }
  func.func @transform_4(%arg0: i32) -> (i32, i32) {
    %c0_i32 = arith.constant 0 : i32
    %c0_i32_0 = arith.constant 0 : i32
    %c0_i32_1 = arith.constant 0 : i32
    return %c0_i32, %c0_i32_0 : i32, i32
  }
  func.func @transform_5(%arg0: i32) -> (i32, i32) {
    %c0_i32 = arith.constant 0 : i32
    %c0_i32_0 = arith.constant 0 : i32
    %c0_i32_1 = arith.constant 0 : i32
    return %c0_i32, %c0_i32_0 : i32, i32
  }
}

</mosaic_0001>

<bundles_post_ra>
// kernel: linear_probe_forward.1
= control target key start
LH: loop header
LB: loop body
LE: loop exit
PB: predicated region body
PF: predicated region fallthrough
CT: control target
= control target key end

     0   :  { %vm27_vm0 = vcmask 64512   ;;  %v635_v5 = vmov 0.0   ;;  %s770_s0 = inlined_call_operand.vmem [shape: f32[8,512], index: 0, kind: input, shape index: {}]   ;;  %s771_s1 = inlined_call_operand.vmem [shape: f32[16,8], index: 1, kind: input, shape index: {}]   ;;  %s772_s2 = inlined_call_operand.vmem [shape: f32[2,16,512], index: 2, kind: input, shape index: {}]   ;;  %s773_s3 = inlined_call_operand.vmem [shape: f32[2,16], index: 3, kind: input, shape index: {}]   ;;  %s774_s4 = inlined_call_operand.vmem [shape: f32[1,2], index: 4, kind: input, shape index: {}]   ;;  %s775_s5 = inlined_call_operand.hbm [shape: f32[2,2], index: 5, kind: output, shape index: {}]  }
   0x1   :  { %v24_v0 = vld [vmem:[%s770_s0 + $0x8] sm:$0xff]  ;;  %v26_v1 = vld [vmem:[%s770_s0 + $0x18] sm:$0xff]  ;;  %v23_v2 = vld [vmem:[%s770_s0] sm:$0xff]  ;;  %98 = vmatprep.mubr.f32.mxu0 %v635_v5 }
   0x2   :  { %34 = vmatprep.subr.mxu0 %v24_v0  ;;  %111 = vmatprep.subr.mxu1 %v26_v1  ;;  %v25_v3 = vld [vmem:[%s770_s0 + $0x10] sm:$0xff]  ;;  %v21_v4 = vld [vmem:[%s771_s1] sm:$0xff] }
   0x3   :  { %35 = vmatpush1.msra.mxu0 %v23_v2 }
   0x4   :  { %10 = vsyncpa [#allocation3], 0  ;;  %112 = vmatpush1.msra.mxu1 %v25_v3  ;;  %175 = vmatprep.mubr.f32.mxu1 %v635_v5  ;;  %v22_v6 = vld [vmem:[%s771_s1 + $0x8] sm:$0xff]  ;;  %v196_v8 = vld [vmem:[%s772_s2] sm:$0xff]  ;;  %vm213_vm1 = vcmask 130048   ;;  %vm359_vm2 = vcmask 1041408  }
   0x5   :  { %575 = vmatmul.mubr.msk.f32.vlgmr.msra.gmra.mrb[0].mxu0 %vm27_vm0, %v21_v4  ;;  %577 = vmatmul.mubr.msk.f32.vlgmr.msra.gmra.mrb[0].mxu1 %vm27_vm0, %v21_v4  ;;  %v582_v9 = vld [vmem:[%s772_s2 + $0x40] sm:$0xff]  ;;  %v197_v10 = vld [vmem:[%s772_s2 + $0x8] sm:$0xff]  ;;  %v198_v15 = vld [vmem:[%s772_s2 + $0x10] sm:$0xff]  ;;  %vm377_vm3 = vcmask 1024   ;;  %s636_s12 = smov [#allocation2]   ;;  %vm559_vm4 = vcmask 9224  }
   0x6   :  { %104 = vmatprep.mubr.f32.mxu0 %v635_v5  ;;  %181 = vmatprep.mubr.f32.mxu1 %v635_v5  ;;  %v584_v16 = vld [vmem:[%s772_s2 + $0x50] sm:$0xff]  ;;  %v583_v19 = vld [vmem:[%s772_s2 + $0x48] sm:$0xff]  ;;  %v199_v21 = vld [vmem:[%s772_s2 + $0x18] sm:$0xff]  ;;  %s567_s13 = sshll.u32 %s636_s12, 4  ;;  %s568_s13 = int_to_ptr.vmem [resolvable:$true] %s567_s13 }
   0x7   :  { %v585_v22 = vld [vmem:[%s772_s2 + $0x58] sm:$0xff]  ;;  %v200_v23 = vld [vmem:[%s772_s2 + $0x20] sm:$0xff]  ;;  %v202_v25 = vld [vmem:[%s772_s2 + $0x30] sm:$0xff]  ;;  %s611_s14 = scalar_lea.vmem %s568_s13, 32  ;;  %p616_p1 = scmp.lt.s32.totalorder %s568_s13, %s568_s13 }
   0x8   :  { %v586_v24 = vld [vmem:[%s772_s2 + $0x60] sm:$0xff]  ;;  %v588_v32 = vld [vmem:[%s772_s2 + $0x70] sm:$0xff]  ;;  %v201_v33 = vld [vmem:[%s772_s2 + $0x28] sm:$0xff]  ;;  %p612_p0 = scmp.ne.s32.totalorder %s568_s13, %s611_s14  ;;  %p617_p2 = scmp.lt.s32.totalorder %s611_s14, %s611_s14 }
   0x9   :  { %576 = vmatmul.mubr.msk.f32.gmra.mrb[2].mxu0 %vm27_vm0, %v22_v6  ;;  %578 = vmatmul.mubr.msk.f32.gmra.mrb[2].mxu1 %vm27_vm0, %v22_v6  ;;  %v587_v34 = vld [vmem:[%s772_s2 + $0x68] sm:$0xff]  ;;  %v203_v41 = vld [vmem:[%s772_s2 + $0x38] sm:$0xff]  ;;  %v212_v63 = vld [vmem:[%s773_s3] sm:$0x3] }
   0xa   :  { %281 = vmatprep.mubr.f32.mxu0 %v635_v5  ;;  %352 = vmatprep.mubr.f32.mxu1 %v635_v5  ;;  %v589_v42 = vld [vmem:[%s772_s2 + $0x78] sm:$0xff]  ;;  %v396_v0 = vld [vmem:[%s773_s3] sm:$0x3]  ;;  %p618_p3 = por %p617_p2, %p616_p1 }
   0xc   :  { %p619_p4 = pnand %p618_p3, %p612_p0 }
  0xd8   :  { %v100_v7 = vpop.f32.mrb[0].mxu0  ;;  %v177_v11 = vpop.f32.mrb[0].mxu1 }
  0xd9   :  { %v188_v12 = vmax.f32 %v100_v7, 0.0  ;;  %v102_v13 = vpop.f32.mrb[1].mxu0  ;;  %v190_v14 = vmax.f32 %v177_v11, 0.0  ;;  %v179_v17 = vpop.f32.mrb[1].mxu1 }
  0xda   :  { %v189_v18 = vmax.f32 %v102_v13, 0.0  ;;  %v191_v20 = vmax.f32 %v179_v17, 0.0 }
  0xdb   :  { %v204_v26 = vmul.f32 %v196_v8, %v188_v12  ;;  %v388_v27 = vmul.f32 %v582_v9, %v188_v12  ;;  %v206_v28 = vmul.f32 %v198_v15, %v190_v14  ;;  %v390_v29 = vmul.f32 %v584_v16, %v190_v14 }
  0xdc   :  { %v106_v30 = vpop.f32.mrb[2].mxu0  ;;  %v183_v31 = vpop.f32.mrb[2].mxu1  ;;  %v205_v35 = vmul.f32 %v197_v10, %v189_v18  ;;  %v389_v36 = vmul.f32 %v583_v19, %v189_v18  ;;  %v207_v43 = vmul.f32 %v199_v21, %v191_v20  ;;  %v391_v44 = vmul.f32 %v585_v22, %v191_v20 }
  0xdd   :  { %v192_v37 = vmax.f32 %v106_v30, 0.0  ;;  %v194_v38 = vmax.f32 %v183_v31, 0.0  ;;  %v108_v39 = vpop.f32.mrb[3].mxu0  ;;  %v185_v40 = vpop.f32.mrb[3].mxu1 }
  0xde   :  { %v193_v45 = vmax.f32 %v108_v39, 0.0  ;;  %v195_v46 = vmax.f32 %v185_v40, 0.0 }
  0xdf   :  { %v208_v47 = vmul.f32 %v200_v23, %v192_v37  ;;  %v392_v48 = vmul.f32 %v586_v24, %v192_v37  ;;  %v210_v49 = vmul.f32 %v202_v25, %v194_v38  ;;  %v394_v50 = vmul.f32 %v588_v32, %v194_v38  ;;  %v581_v23 = vld [vmem:[%s774_s4] ss:$0 sm:$0xff] }
  0xe0   :  { %v209_v51 = vmul.f32 %v201_v33, %v193_v45  ;;  %v393_v52 = vmul.f32 %v587_v34, %v193_v45  ;;  %v211_v53 = vmul.f32 %v203_v41, %v195_v46  ;;  %v395_v54 = vmul.f32 %v589_v42, %v195_v46 }
  0xe1   :  { %v595_v55 = vpack.c.bf16 %v208_v47, %v204_v26  ;;  %v603_v56 = vpack.c.bf16 %v392_v48, %v388_v27  ;;  %v599_v57 = vpack.c.bf16 %v210_v49, %v206_v28  ;;  %v607_v58 = vpack.c.bf16 %v394_v50, %v390_v29 }
  0xe2   :  { %v593_v59 = vpack.c.bf16 %v209_v51, %v205_v35  ;;  %v597_v60 = vpack.c.bf16 %v211_v53, %v207_v43  ;;  %v601_v61 = vpack.c.bf16 %v393_v52, %v389_v36  ;;  %v605_v62 = vpack.c.bf16 %v395_v54, %v391_v44 }
  0xe4   :  { %594 = vmatprep.subr.bf16.mxu0 %v593_v59  ;;  %598 = vmatprep.subr.bf16.mxu1 %v597_v60 }
  0xe5   :  { %596 = vmatpush1.bf16.msra.mxu0 %v595_v55  ;;  %600 = vmatpush1.bf16.msra.mxu1 %v599_v57 }
  0xe6   :  { %602 = vmatprep.subr.bf16.mxu0 %v601_v61  ;;  %606 = vmatprep.subr.bf16.mxu1 %v605_v62 }
  0xe8   :  { %579 = vmatmul.mubr.msk.f32.vlgmr.msra.gmra.mrb[4].mxu0 %vm213_vm1, %v212_v63  ;;  %580 = vmatmul.mubr.msk.f32.vlgmr.msra.gmra.mrb[4].mxu1 %vm213_vm1, %v212_v63 }
  0xe9   :  { %604 = vmatpush1.bf16.msra.mxu0 %v603_v56  ;;  %608 = vmatpush1.bf16.msra.mxu1 %v607_v58 }
  0xea   :  { %464 = vmatprep.mubr.f32.mxu0 %v635_v5  ;;  %535 = vmatprep.mubr.f32.mxu1 %v635_v5 }
  0xec   :  { %590 = vmatmul.mubr.msk.f32.vlgmr.msra.gmra.mrb[6].mxu0 %vm213_vm1, %v396_v0  ;;  %591 = vmatmul.mubr.msk.f32.vlgmr.msra.gmra.mrb[6].mxu1 %vm213_vm1, %v396_v0 }
 0x1bb   :  { %v283_v1 = vpop.f32.mrb[4].mxu0  ;;  %v354_v2 = vpop.f32.mrb[4].mxu1 }
 0x1bc   :  { %v360_v3 = vsel %vm359_vm2, %v283_v1, 0.0  ;;  %v285_v4 = vpop.f32.mrb[5].mxu0  ;;  %v356_v6 = vpop.f32.mrb[5].mxu1  ;;  %v363_v8 = vsel %vm359_vm2, %v354_v2, 0.0 }
 0x1bd   :  { %v361_v7 = vsel %vm359_vm2, %v285_v4, 0.0  ;;  %v365_v15 = vsel %vm359_vm2, %v356_v6, 0.0 }
 0x1be   :  { %v362_v9 = vadd.f32 %v361_v7, %v360_v3 }
 0x1bf   :  { %v466_v10 = vpop.f32.mrb[6].mxu0  ;;  %v537_v11 = vpop.f32.mrb[6].mxu1 }
 0x1c0   :  { %v364_v12 = vadd.f32 %v363_v8, %v362_v9  ;;  %v542_v13 = vsel %vm359_vm2, %v466_v10, 0.0  ;;  %v468_v5 = vpop.f32.mrb[7].mxu0  ;;  %v539_v14 = vpop.f32.mrb[7].mxu1  ;;  %v545_v17 = vsel %vm359_vm2, %v537_v11, 0.0 }
 0x1c1   :  { %v543_v16 = vsel %vm359_vm2, %v468_v5, 0.0  ;;  %v547_v21 = vsel %vm359_vm2, %v539_v14, 0.0 }
 0x1c2   :  { %v544_v18 = vadd.f32 %v543_v16, %v542_v13  ;;  %v366_v19 = vadd.f32 %v365_v15, %v364_v12 }
 0x1c4   :  { %v546_v20 = vadd.f32 %v545_v17, %v544_v18  ;;  %367 = vadd.xlane.f32.xlu0 %v366_v19 }
 0x1c6   :  { %v548_v22 = vadd.f32 %v547_v21, %v546_v20 }
 0x1c8   :  { %549 = vadd.xlane.f32.xlu0 %v548_v22 }
 0x251   :  { %v368_v24 = vpop.xlane.xlu0 %367 }
 0x252   :  { %v376_v25 = vadd.f32 %v581_v23, %v368_v24 }
 0x254   :  { %378 = vst.msk [vmem:[#allocation2] sm:$0x3] %vm377_vm3, %v376_v25 }
 0x255   :  { %v550_v26 = vpop.xlane.xlu0 %549 }
 0x256   :  { %v558_v27 = vadd.f32 %v581_v23, %v550_v26 }
 0x258   :  { %560 = vst.msk [vmem:[#allocation2] sm:$0x3] %vm559_vm4, %v558_v27 }
 0x259   :  { %622 = shalt.err (!%p619_p4)
}
 0x25a   :  { %s623_s16 = scalar_lea.hbm %s775_s5, 32 }
 0x25b   :  { %p624_p5 = scmp.ne.s32.totalorder %s775_s5, %s623_s16  ;;  %p627_p6 = scmp.lt.u32.totalorder %s623_s16, %s775_s5 }
 0x25d   :  { %p629_p7 = pnand %p627_p6, %p624_p5 }
 0x25f   :  { %632 = shalt.err (!%p629_p7)
}
 0x260   :  { %570 = dma.vmem_to_hbm [thread:$0]  %s568_s13, 32, %s775_s5, [#allocation3]  }
 0x261   :  { %633 = dma.done.wait [#allocation3], 32  }
 0x262   :  { %634 = vsyncadd [#allocation3], 4294967264 }
 0x263   :  { %574 = vsyncpa [#allocation3], 1 }

</bundles_post_ra>
